<compile_context>
chip_gen: v6e
topology: v6e:2x2x1
jax: 0.10.0
libtpu: 0.0.40
codegen_flags: <defaults>
</compile_context>

<pallas_src>
import jax
import jax.numpy as jnp
from jax.experimental import pallas as pl
from jax.experimental.pallas import tpu as pltpu


def _round_up(x, m):
    return (x + m - 1) // m * m


def _probe_roll_is_numpy():
    """True if pltpu.roll follows jnp.roll semantics (result[i] = x[i - shift]).

    Resolved once at import with a tiny kernel so the reflect-pad tap
    construction is rotate-direction-proof across backend revisions.
    """
    def k(x_ref, o_ref):
        o_ref[...] = pltpu.roll(x_ref[...], 1, 1)

    x = jnp.tile(jnp.arange(128, dtype=jnp.int32)[None, :], (8, 1))
    y = pl.pallas_call(k, out_shape=jax.ShapeDtypeStruct((8, 128), jnp.int32))(x)
    return int(y[0, 0]) == 127


_ROLL_IS_NUMPY = _probe_roll_is_numpy()


def _make_resnet_block_kernel(C, Cp, H, W, roll_is_numpy):
    """Fused kernel for one batch element held as a (C, H*W) lane-dense tile."""
    L = H * W
    K = 9 * Cp  # im2col contraction size (channel dim padded to sublane multiple)

    def shifted(v, d):
        # result[..., p] = v[..., (p + d) % L]  (cyclic read d lanes to the right)
        s = (-d) % L if roll_is_numpy else d % L
        return pltpu.roll(v, s, 1)

    def kernel(x_ref, w1_ref, s1_ref, b1_ref, w2_ref, s2_ref, b2_ref,
               out_ref, patches_ref):
        # Zero the channel-padding rows of the im2col scratch.  Their matching
        # weight columns are zero, but uninitialized VMEM could hold NaNs.
        # (Done every step so it is also megacore-safe with a parallel grid.)
        if Cp > C:
            zpad = jnp.zeros((Cp - C, L), jnp.float32)
            for t in range(9):
                patches_ref[t * Cp + C:(t + 1) * Cp, :] = zpad

        x = x_ref[0].astype(jnp.float32)                       # (C, L)

        # Lane-index masks for reflect-pad boundaries (flat index p = h*W + w).
        pos = jax.lax.broadcasted_iota(jnp.int32, (C, L), 1)
        col = pos % W
        first_col = col == 0
        last_col = col == W - 1
        first_row = pos < W
        last_row = pos >= L - W

        def im2col(v):
            """Write the 9 reflect-padded 3x3 taps of v (C, L) into the VMEM
            scratch so the conv becomes one (Cout, 9*Cp) @ (9*Cp, L) matmul."""
            nxt = shifted(v, 1)      # value at column w+1 (same row)
            prv = shifted(v, -1)     # value at column w-1 (same row)
            cols = (
                jnp.where(first_col, nxt, prv),   # dx=0: column w-1 (reflect at w=0)
                v,                                # dx=1: column w
                jnp.where(last_col, prv, nxt),    # dx=2: column w+1 (reflect at w=W-1)
            )
            for dx, xc in enumerate(cols):
                dn = shifted(xc, W)   # value at row h+1
                up = shifted(xc, -W)  # value at row h-1
                rows = (
                    jnp.where(first_row, dn, up),  # dy=0: row h-1 (reflect at h=0)
                    xc,                            # dy=1: row h
                    jnp.where(last_row, up, dn),   # dy=2: row h+1 (reflect at h=H-1)
                )
                for dy, tap in enumerate(rows):
                    t = dy * 3 + dx
                    patches_ref[t * Cp:t * Cp + C, :] = tap

        # ---- block1: reflect-pad 3x3 conv + folded BN + ReLU ----------------
        im2col(x)
        h = jnp.dot(w1_ref[...], patches_ref[...],
                    preferred_element_type=jnp.float32)        # (C, L)
        h = jnp.maximum(h * s1_ref[...] + b1_ref[...], 0.0)

        # ---- block2: reflect-pad 3x3 conv + folded BN -----------------------
        im2col(h)
        y = jnp.dot(w2_ref[...], patches_ref[...],
                    preferred_element_type=jnp.float32)        # (C, L)
        y = y * s2_ref[...] + b2_ref[...]

        # ---- residual add + final ReLU (lane-dense store) -------------------
        out_ref[0] = jnp.maximum(x + y, 0.0).astype(out_ref.dtype)

    return kernel


def _fold_bn(gamma, beta, mean, var, eps=1e-5):
    scale = gamma / jnp.sqrt(var + eps)
    shift = beta - mean * scale
    return scale, shift


def _flatten_conv_weight(w, Cp):
    """PyTorch Conv2d weight (Cout, Cin, 3, 3) -> (Cout, 9*Cp), tap-major,
    with the input-channel dim zero-padded to the sublane multiple Cp."""
    Cout, Cin, KH, KW = w.shape
    w = jnp.transpose(w, (0, 2, 3, 1))                       # (Cout, kh, kw, Cin)
    w = jnp.pad(w, ((0, 0), (0, 0), (0, 0), (0, Cp - Cin)))
    return w.reshape(Cout, KH * KW * Cp).astype(jnp.float32)


def resnet_block_forward(x_nchw, params):
    """Matches ResnetBlock.forward (expansion=1, eval-mode BatchNorm), NCHW in/out."""
    N, C, H, W = x_nchw.shape
    L = H * W
    Cp = _round_up(C, 8)

    assert params["w1"].shape == (C, C, 3, 3), "expansion != 1 not supported"
    assert params["w2"].shape == (C, C, 3, 3), "expansion != 1 not supported"

    w1 = _flatten_conv_weight(params["w1"], Cp)
    w2 = _flatten_conv_weight(params["w2"], Cp)
    s1, b1 = _fold_bn(params["gamma1"], params["beta1"],
                      params["mean1"], params["var1"])
    s2, b2 = _fold_bn(params["gamma2"], params["beta2"],
                      params["mean2"], params["var2"])
    s1 = s1.reshape(C, 1).astype(jnp.float32)
    b1 = b1.reshape(C, 1).astype(jnp.float32)
    s2 = s2.reshape(C, 1).astype(jnp.float32)
    b2 = b2.reshape(C, 1).astype(jnp.float32)

    # Free row-major collapse: NCHW stays native, no transpose / pad XLA passes.
    x_flat = x_nchw.reshape(N, C, L)

    kernel = _make_resnet_block_kernel(C, Cp, H, W, _ROLL_IS_NUMPY)
    full = lambda n: (0, 0)

    out_flat = pl.pallas_call(
        kernel,
        out_shape=jax.ShapeDtypeStruct((N, C, L), x_nchw.dtype),
        grid_spec=pltpu.PrefetchScalarGridSpec(
            num_scalar_prefetch=0,
            grid=(N,),
            in_specs=[
                pl.BlockSpec((1, C, L), lambda n: (n, 0, 0)),   # x (lane-dense)
                pl.BlockSpec((C, 9 * Cp), full),                # w1 (flattened)
                pl.BlockSpec((C, 1), full),                     # BN1 scale
                pl.BlockSpec((C, 1), full),                     # BN1 shift
                pl.BlockSpec((C, 9 * Cp), full),                # w2 (flattened)
                pl.BlockSpec((C, 1), full),                     # BN2 scale
                pl.BlockSpec((C, 1), full),                     # BN2 shift
            ],
            out_specs=pl.BlockSpec((1, C, L), lambda n: (n, 0, 0)),
            scratch_shapes=[pltpu.VMEM((9 * Cp, L), jnp.float32)],  # im2col buffer
        ),
        compiler_params=pltpu.CompilerParams(
            dimension_semantics=("parallel",),
        ),
    )(x_flat, w1, s1, b1, w2, s2, b2)

    return out_flat.reshape(N, C, H, W)


if __name__ == "__main__":
    key = jax.random.PRNGKey(0)
    planes = 4
    N, H, W = 2, 16, 16

    ks = jax.random.split(key, 11)
    x = jax.random.normal(ks[0], (N, planes, H, W), jnp.float32)

    params = dict(
        # Conv2d weights in PyTorch layout (Cout, Cin, kh, kw); bias=False.
        w1=0.1 * jax.random.normal(ks[1], (planes, planes, 3, 3), jnp.float32),
        w2=0.1 * jax.random.normal(ks[2], (planes, planes, 3, 3), jnp.float32),
        gamma1=1.0 + 0.1 * jax.random.normal(ks[3], (planes,), jnp.float32),
        beta1=0.1 * jax.random.normal(ks[4], (planes,), jnp.float32),
        mean1=0.1 * jax.random.normal(ks[5], (planes,), jnp.float32),
        var1=1.0 + jnp.abs(jax.random.normal(ks[6], (planes,), jnp.float32)),
        gamma2=1.0 + 0.1 * jax.random.normal(ks[7], (planes,), jnp.float32),
        beta2=0.1 * jax.random.normal(ks[8], (planes,), jnp.float32),
        mean2=0.1 * jax.random.normal(ks[9], (planes,), jnp.float32),
        var2=1.0 + jnp.abs(jax.random.normal(ks[10], (planes,), jnp.float32)),
    )

    out = jax.jit(resnet_block_forward)(x, params)
    jax.block_until_ready(out)
    assert out.shape == (N, planes, H, W)
    assert bool(jnp.isfinite(out).all())
    print("KERNEL_OK")
</pallas_src>

<mosaic_0001>
module attributes {stable_mosaic.version = 11 : i64} {
  func.func @k(%arg0: memref<8x128xi32, #tpu.memory_space<vmem>>, %arg1: memref<8x128xi32, #tpu.memory_space<vmem>>) attributes {dimension_semantics = [], scalar_prefetch = 0 : i64, scratch_operands = 0 : i64, tpu.core_type = #tpu.core_type<tc>} {
    %c0 = arith.constant 0 : index
    %c0_0 = arith.constant 0 : index
    %0 = vector.load %arg0[%c0, %c0_0] : memref<8x128xi32, #tpu.memory_space<vmem>>, vector<8x128xi32>
    %c1_i32 = arith.constant 1 : i32
    %1 = tpu.dynamic_rotate %0 by %c1_i32 dim 1 : vector<8x128xi32>, i32 -> vector<8x128xi32>
    %c0_1 = arith.constant 0 : index
    %c0_2 = arith.constant 0 : index
    %2 = vector.load %arg1[%c0_1, %c0_2] : memref<8x128xi32, #tpu.memory_space<vmem>>, vector<8x128xi32>
    tpu.vector_store %arg1[%c0_1, %c0_2], %1 {strides = array<i32>} : memref<8x128xi32, #tpu.memory_space<vmem>>, vector<8x128xi32>,
    return
  }
}

</mosaic_0001>

<bundles_post_ra>
// kernel: tpu_custom_call.1
= control target key start
LH: loop header
LB: loop body
LE: loop exit
PB: predicated region body
PF: predicated region fallthrough
CT: control target
= control target key end

     0   :  { %6 = vsyncpa [#allocation3], 0  ;;  %s106_s0 = inlined_call_operand.hbm [shape: s32[8,128], index: 0, kind: input, shape index: {}]   ;;  %s107_s1 = inlined_call_operand.hbm [shape: s32[8,128], index: 1, kind: output, shape index: {}]  }
   0x1   :  { %7 = vsyncpa [#allocation4], 0  ;;  %s87_s6 = smov [#allocation2]  }
   0x2   :  { %s14_s7 = sshll.u32 %s87_s6, 4  ;;  %s15_s7 = int_to_ptr.vmem [resolvable:$true] %s14_s7 }
   0x3   :  { %s51_s8 = scalar_lea.vmem %s15_s7, 128  ;;  %p56_p1 = scmp.lt.s32.totalorder %s15_s7, %s15_s7 }
   0x4   :  { %p52_p0 = scmp.ne.s32.totalorder %s15_s7, %s51_s8  ;;  %p57_p2 = scmp.lt.s32.totalorder %s51_s8, %s51_s8 }
   0x6   :  { %p58_p3 = por %p57_p2, %p56_p1 }
   0x8   :  { %p59_p4 = pnand %p58_p3, %p52_p0 }
   0xa   :  { %62 = shalt.err (!%p59_p4)
}
   0xb   :  { %17 = dma.hbm_to_vmem [thread:$0]  %s106_s0, 128, %s15_s7, [#allocation3]  }
   0xc   :  { %83 = dma.done.wait [#allocation3], 128  }
   0xd   :  { %84 = vsyncadd [#allocation3], 4294967168  ;;  %v21_v0 = vld [vmem:[#allocation2] sm:$0xff]  ;;  %s88_s11 = smov 1   ;;  %s89_s12 = smov [#allocation5]  }
   0xe   :  { %22 = vrot.lane.b32.xlu0 %v21_v0, %s88_s11  ;;  %s31_s13 = sshll.u32 %s89_s12, 4  ;;  %s32_s13 = int_to_ptr.vmem [resolvable:$true] %s31_s13 }
   0xf   :  { %s63_s14 = scalar_lea.vmem %s32_s13, 128  ;;  %p68_p6 = scmp.lt.s32.totalorder %s32_s13, %s32_s13 }
  0x10   :  { %p64_p5 = scmp.ne.s32.totalorder %s32_s13, %s63_s14  ;;  %p69_p7 = scmp.lt.s32.totalorder %s63_s14, %s63_s14 }
  0x12   :  { %p70_p8 = por %p69_p7, %p68_p6 }
  0x14   :  { %p71_p9 = pnand %p70_p8, %p64_p5 }
  0x80   :  { %v23_v1 = vpop.permute.xlu0 %22 }
  0x81   :  { %24 = vst [vmem:[#allocation5] sm:$0xff] %v23_v1 }
  0x82   :  { %74 = shalt.err (!%p71_p9)
}
  0x83   :  { %34 = dma.vmem_to_hbm [thread:$0]  %s32_s13, 128, %s107_s1, [#allocation4]  }
  0x84   :  { %85 = dma.done.wait [#allocation4], 128  }
  0x85   :  { %86 = vsyncadd [#allocation4], 4294967168 }
  0x86   :  { %38 = vsyncpa [#allocation3], 1 }
  0x87   :  { %39 = vsyncpa [#allocation4], 1 }

</bundles_post_ra>
